<compile_context>
chip_gen: v7x
topology: tpu7x:2x2x1
jax: 0.10.0
libtpu: 0.0.40
codegen_flags: <defaults>
</compile_context>

<pallas_src>
import functools
import math

import jax
import jax.numpy as jnp
from jax.experimental import pallas as pl
from jax.experimental.pallas import tpu as pltpu


# ---------------------------------------------------------------------------
# Geometry embedding (XLA glue)
# ---------------------------------------------------------------------------
def _pairwise_box_features(f_g):
    # TODO(synk): exact BoxTimeIdRelationalEmbedding source was not in the
    # spec; this is the Relation-Networks / PHALP-style log-ratio box geometry
    # plus time / track-id deltas.
    B, N, _ = f_g.shape
    x_min, y_min, x_max, y_max, t, tid = jnp.split(f_g, 6, axis=-1)  # (B,N,1)
    cx = (x_min + x_max) * 0.5
    cy = (y_min + y_max) * 0.5
    w = (x_max - x_min) + 1.0
    h = (y_max - y_min) + 1.0
    delta_x = jnp.log(jnp.maximum(jnp.abs((cx - cx.reshape(B, 1, N)) / w), 1e-3))
    delta_y = jnp.log(jnp.maximum(jnp.abs((cy - cy.reshape(B, 1, N)) / h), 1e-3))
    delta_w = jnp.log(w / w.reshape(B, 1, N))
    delta_h = jnp.log(h / h.reshape(B, 1, N))
    delta_t = t - t.reshape(B, 1, N)
    delta_i = tid - tid.reshape(B, 1, N)
    return jnp.stack([delta_x, delta_y, delta_w, delta_h, delta_t, delta_i],
                     axis=-1)                                        # (B,N,N,6)


def _relative_geometry_embedding(position_mat, dim_g, wave_len=1000.0,
                                 trignometric_embedding=True):
    if not trignometric_embedding:
        return position_mat                                          # (B,N,N,6)
    B, N, _, n_feats = position_mat.shape
    n_freq = dim_g // (2 * n_feats)
    feat_range = jnp.arange(n_freq, dtype=jnp.float32)
    dim_mat = 1.0 / (wave_len ** (feat_range / n_freq))              # (n_freq,)
    ang = (100.0 * position_mat)[..., None] * dim_mat                # (B,N,N,feats,freq)
    ang = ang.reshape(B, N, N, n_feats * n_freq)
    # TODO(synk): move sin/cos into the Pallas kernel once Mosaic sin/cos
    # lowering is confirmed on all target TPU generations; today the trig
    # embedding + per-head geometry linear stay in XLA so only the small
    # (B, h, N, N) logits are DMA'd into the kernel.
    return jnp.concatenate([jnp.sin(ang), jnp.cos(ang)], axis=-1)    # (B,N,N,dim_g)


# ---------------------------------------------------------------------------
# Fused Pallas kernel (one batch element per grid step, all heads batched)
# ---------------------------------------------------------------------------
def _make_kernel(N, H, dk, d_model, inv_sqrt_dk, legacy_extra_skip, need_attn):
    def kernel(*refs):
        it = iter(refs)
        xq_ref, xk_ref, xv_ref, glog_ref = next(it), next(it), next(it), next(it)
        wq_ref, wk_ref, wv_ref = next(it), next(it), next(it)
        bq_ref, bk_ref, bv_ref = next(it), next(it), next(it)
        wo_ref = next(it)                                    # (H, dk, d_model)
        wo_full_ref = next(it) if legacy_extra_skip else None
        bo_ref = next(it)                                    # (1, d_model)
        out_ref = next(it)
        attn_ref = next(it) if need_attn else None

        xq = xq_ref[0]                                       # (N, d_model)
        xk = xk_ref[0]
        xv = xv_ref[0]

        def project(x, w_ref, b_ref):
            # Head-batched projection: (H,N,d) x (H,d,dk) -> (H,N,dk).
            # Leading-batch-dim einsum, no lane slicing, same FLOPs as one
            # (d_model, d_model) matmul.
            xb = jnp.broadcast_to(x[None], (H, N, d_model))
            return jnp.einsum('hnd,hdk->hnk', xb, w_ref[...],
                              preferred_element_type=jnp.float32) + b_ref[...]

        q = project(xq, wq_ref, bq_ref)                      # (H, N, dk)
        k = project(xk, wk_ref, bk_ref)
        v = project(xv, wv_ref, bv_ref)

        # Scaled dot-product scores, all heads at once.
        s = jnp.einsum('hqd,hkd->hqk', q, k,
                       preferred_element_type=jnp.float32) * inv_sqrt_dk
        # log(clamp(relu(geo_logits), 1e-6)) == log(max(geo_logits, 1e-6))
        w_mn = jnp.log(jnp.maximum(glog_ref[0], 1e-6)) + s
        w_mn = w_mn - jnp.max(w_mn, axis=-1, keepdims=True)
        e = jnp.exp(w_mn)
        # Exact softmax normalization (parity with torch.nn.Softmax).
        p = e / jnp.sum(e, axis=-1, keepdims=True)           # (H, N, N)
        if attn_ref is not None:
            attn_ref[0] = p                                  # one batched store

        ctx = jnp.einsum('hqk,hkd->hqd', p, v,
                         preferred_element_type=jnp.float32)  # (H, N, dk)
        # concat_h(ctx_h) @ W_out == sum_h ctx_h @ W_out[h*dk:(h+1)*dk, :]
        o = jnp.sum(jnp.einsum('hnd,hde->hne', ctx, wo_ref[...],
                               preferred_element_type=jnp.float32), axis=0)
        if legacy_extra_skip:
            # (input_value + concat(ctx)) @ W_out  ->  add input_value @ W_out
            o = o + jnp.dot(xv, wo_full_ref[...],
                            preferred_element_type=jnp.float32)
        out_ref[0] = o + bo_ref[...]                         # one lane-dense store

    return kernel


# ---------------------------------------------------------------------------
# Jitted forward (XLA glue + one pallas_call with a grid over B)
# ---------------------------------------------------------------------------
@functools.partial(jax.jit,
                   static_argnames=("h", "trignometric_embedding",
                                    "legacy_extra_skip", "need_attn"))
def _box_mha_forward(params, input_query, input_key, input_value, input_box,
                     *, h, trignometric_embedding, legacy_extra_skip,
                     need_attn):
    B, N, d_model = input_query.shape
    dk = d_model // h
    dim_g = params["wg_w"].shape[0]
    hp = jax.lax.Precision.HIGHEST

    xq = input_query.astype(jnp.float32)
    xk = input_key.astype(jnp.float32)
    xv = input_value.astype(jnp.float32)

    # Geometry pipeline in XLA: pairwise features -> trig embedding -> dense
    # (dim_g, h) per-head linear -> (B, h, N, N) logits.  No block-diagonal
    # zero-padded weight, no O(N^3) FLOPs, and only B*h*N^2 floats reach HBM.
    pos = _pairwise_box_features(input_box.astype(jnp.float32))
    emb = _relative_geometry_embedding(
        pos, dim_g, trignometric_embedding=trignometric_embedding)
    glog = (jnp.einsum('bijc,ch->bhij', emb, params["wg_w"], precision=hp)
            + params["wg_b"][None, :, None, None])            # (B, h, N, N)

    operands = [xq, xk, xv, glog,
                params["wq"], params["wk"], params["wv"],
                params["bq"], params["bk"], params["bv"],
                params["wo_heads"]]
    if legacy_extra_skip:
        operands.append(params["wo_full"])
    operands.append(params["bo"])

    data_spec = pl.BlockSpec((1, N, d_model), lambda b: (b, 0, 0))
    glog_spec = pl.BlockSpec((1, h, N, N), lambda b: (b, 0, 0, 0))

    def const_spec(a):
        nd = a.ndim
        return pl.BlockSpec(a.shape, lambda b, _nd=nd: (0,) * _nd)

    in_specs = [data_spec, data_spec, data_spec, glog_spec]
    in_specs += [const_spec(a) for a in operands[4:]]

    out_shapes = [jax.ShapeDtypeStruct((B, N, d_model), jnp.float32)]
    out_specs = [pl.BlockSpec((1, N, d_model), lambda b: (b, 0, 0))]
    if need_attn:
        out_shapes.append(jax.ShapeDtypeStruct((B, h, N, N), jnp.float32))
        out_specs.append(pl.BlockSpec((1, h, N, N), lambda b: (b, 0, 0, 0)))

    # VMEM budget and cost hints.
    itemsize = 4
    per_step_io = itemsize * (3 * N * d_model + h * N * N + N * d_model
                              + (h * N * N if need_attn else 0))
    weight_bytes = itemsize * sum(int(a.size) for a in operands[4:])
    vmem_limit = int(min(64 * 1024 * 1024,
                         2 * per_step_io + 2 * weight_bytes + (8 << 20)))
    flops = 2 * B * (4 * N * d_model * d_model + 2 * h * N * N * dk)
    if legacy_extra_skip:
        flops += 2 * B * N * d_model * d_model
    cost = pl.CostEstimate(flops=int(flops),
                           transcendentals=int(2 * B * h * N * N),
                           bytes_accessed=int(B * per_step_io + weight_bytes))

    kernel = _make_kernel(N, h, dk, d_model, 1.0 / math.sqrt(dk),
                          legacy_extra_skip, need_attn)
    res = pl.pallas_call(
        kernel,
        out_shape=tuple(out_shapes),
        grid=(B,),
        in_specs=in_specs,
        out_specs=tuple(out_specs),
        compiler_params=pltpu.CompilerParams(
            dimension_semantics=("parallel",),
            vmem_limit_bytes=vmem_limit),
        cost_estimate=cost,
    )(*operands)

    if need_attn:
        return res[0], res[1]
    return res[0], None


# ---------------------------------------------------------------------------
# Pure-JAX reference (self-test only)
# ---------------------------------------------------------------------------
def _reference_forward(params, xq, xk, xv, box, *, h, trignometric_embedding,
                       legacy_extra_skip):
    B, N, d_model = xq.shape
    dk = d_model // h
    dim_g = params["wg_w"].shape[0]
    hp = jax.lax.Precision.HIGHEST

    pos = _pairwise_box_features(box.astype(jnp.float32))
    emb = _relative_geometry_embedding(
        pos, dim_g, trignometric_embedding=trignometric_embedding)
    wg = (jnp.einsum('bijc,ch->bhij', emb, params["wg_w"], precision=hp)
          + params["wg_b"][None, :, None, None])
    wg = jnp.maximum(wg, 0.0)                                 # ReLU

    def full_w(w_h):   # (h, d_model, dk) -> (d_model, d_model)
        return w_h.transpose(1, 0, 2).reshape(d_model, d_model)

    def proj(x, wn, bn):
        y = jnp.dot(x, full_w(params[wn]), precision=hp) + params[bn].reshape(-1)
        return y.reshape(B, N, h, dk).transpose(0, 2, 1, 3)

    q = proj(xq.astype(jnp.float32), "wq", "bq")
    k = proj(xk.astype(jnp.float32), "wk", "bk")
    v = proj(xv.astype(jnp.float32), "wv", "bv")
    s = jnp.einsum('bhqd,bhkd->bhqk', q, k, precision=hp) / math.sqrt(dk)
    w_mn = jnp.log(jnp.maximum(wg, 1e-6)) + s
    p = jax.nn.softmax(w_mn, axis=-1)
    ctx = jnp.einsum('bhqk,bhkd->bhqd', p, v, precision=hp)
    x = ctx.transpose(0, 2, 1, 3).reshape(B, N, d_model)
    if legacy_extra_skip:
        x = xv.astype(jnp.float32) + x
    out = jnp.dot(x, params["wo_full"], precision=hp) + params["bo"].reshape(-1)
    return out, p


# ---------------------------------------------------------------------------
# Module wrapper
# ---------------------------------------------------------------------------
class BoxMultiHeadedAttentionPallas:
    """Pallas-TPU port of PHALP's BoxMultiHeadedAttention (eval mode)."""

    def __init__(self, h, d_model, key, trignometric_embedding=True,
                 legacy_extra_skip=False, box_feats=6):
        assert d_model % h == 0
        # TODO(synk): Box(4-feat)/BoxTime(5-feat) relational embeddings not ported.
        assert box_feats == 6
        self.h = h
        self.d_model = d_model
        self.d_k = d_model // h
        self.box_feats = box_feats
        self.trignometric_embedding = trignometric_embedding
        self.legacy_extra_skip = legacy_extra_skip
        self.dim_g = 16 * box_feats if trignometric_embedding else box_feats
        self.box_attn = None

        keys = jax.random.split(key, 4 + h)

        def lin_init(k, fan_in, fan_out):
            kw, kb = jax.random.split(k)
            bound = 1.0 / math.sqrt(fan_in)
            w = jax.random.uniform(kw, (fan_in, fan_out), jnp.float32, -bound, bound)
            b = jax.random.uniform(kb, (fan_out,), jnp.float32, -bound, bound)
            return w, b

        dk = self.d_k
        wq, bq = lin_init(keys[0], d_model, d_model)
        wk, bk = lin_init(keys[1], d_model, d_model)
        wv, bv = lin_init(keys[2], d_model, d_model)
        wo, bo = lin_init(keys[3], d_model, d_model)

        def head_cols(w, b):
            # Columns grouped per head -> head-stacked (h, d_model, dk)/(h, 1, dk).
            return (w.reshape(d_model, h, dk).transpose(1, 0, 2),
                    b.reshape(h, 1, dk))

        wq_h, bq_h = head_cols(wq, bq)
        wk_h, bk_h = head_cols(wk, bk)
        wv_h, bv_h = head_cols(wv, bv)

        # h x nn.Linear(dim_g, 1) -> dense (dim_g, h) weight + (h,) bias.
        wgs = [lin_init(keys[4 + i], self.dim_g, 1) for i in range(h)]
        wg_w = jnp.concatenate([w for w, _ in wgs], axis=1)          # (dim_g, h)
        wg_b = jnp.concatenate([b for _, b in wgs], axis=0)          # (h,)

        self.params = dict(
            wq=wq_h, bq=bq_h, wk=wk_h, bk=bk_h, wv=wv_h, bv=bv_h,
            wo_heads=wo.reshape(h, dk, d_model),   # per-head row blocks of W_out
            wo_full=wo,
            bo=bo[None, :],
            wg_w=wg_w, wg_b=wg_b)

    def __call__(self, input_query, input_key, input_value, input_box,
                 mask=None, need_attn=False):
        # Dropout is identity (eval mode).
        assert mask is None  # TODO(synk): optional attention-mask path not implemented
        out, attn = _box_mha_forward(
            self.params, input_query, input_key, input_value, input_box,
            h=self.h, trignometric_embedding=self.trignometric_embedding,
            legacy_extra_skip=self.legacy_extra_skip, need_attn=need_attn)
        self.box_attn = attn
        return out


# ---------------------------------------------------------------------------
if __name__ == "__main__":
    key = jax.random.PRNGKey(0)
    k_param, k_q, k_k, k_v, k_box = jax.random.split(key, 5)

    B, N, d_model, h = 2, 8, 32, 4
    attn_mod = BoxMultiHeadedAttentionPallas(h, d_model, k_param)

    input_query = jax.random.normal(k_q, (B, N, d_model), jnp.float32)
    input_key = jax.random.normal(k_k, (B, N, d_model), jnp.float32)
    input_value = jax.random.normal(k_v, (B, N, d_model), jnp.float32)

    # boxes: [x_min, y_min, x_max, y_max, t, id] with x_max>x_min, y_max>y_min
    xy = jax.random.uniform(k_box, (B, N, 2), jnp.float32, 0.0, 0.5)
    wh = jax.random.uniform(jax.random.fold_in(k_box, 1), (B, N, 2),
                            jnp.float32, 0.1, 0.5)
    t = jnp.tile(jnp.arange(N, dtype=jnp.float32)[None, :, None], (B, 1, 1))
    tid = jnp.tile((jnp.arange(N, dtype=jnp.float32) % 3)[None, :, None], (B, 1, 1))
    input_box = jnp.concatenate([xy, xy + wh, t, tid], axis=-1)      # (B, N, 6)

    # Fast path (no attention-weights output).
    out = attn_mod(input_query, input_key, input_value, input_box)
    jax.block_until_ready(out)
    assert out.shape == (B, N, d_model)
    assert attn_mod.box_attn is None

    # Path that also materializes box_attn.
    out2 = attn_mod(input_query, input_key, input_value, input_box,
                    need_attn=True)
    jax.block_until_ready(out2)
    assert out2.shape == (B, N, d_model)
    assert attn_mod.box_attn.shape == (B, h, N, N)
    assert bool(jnp.allclose(out, out2, atol=1e-5))

    # Parity against a pure-JAX reference of the torch module.
    ref_out, ref_p = _reference_forward(
        attn_mod.params, input_query, input_key, input_value, input_box,
        h=h, trignometric_embedding=True, legacy_extra_skip=False)
    assert bool(jnp.allclose(out, ref_out, atol=1e-2, rtol=1e-2))
    assert bool(jnp.allclose(attn_mod.box_attn, ref_p, atol=1e-2, rtol=1e-2))

    # legacy_extra_skip branch.
    legacy_mod = BoxMultiHeadedAttentionPallas(h, d_model, k_param,
                                               legacy_extra_skip=True)
    out3 = legacy_mod(input_query, input_key, input_value, input_box)
    jax.block_until_ready(out3)
    assert out3.shape == (B, N, d_model)
    ref3, _ = _reference_forward(
        legacy_mod.params, input_query, input_key, input_value, input_box,
        h=h, trignometric_embedding=True, legacy_extra_skip=True)
    assert bool(jnp.allclose(out3, ref3, atol=1e-2, rtol=1e-2))

    print("KERNEL_OK")
</pallas_src>

<mosaic_0001>
module attributes {stable_mosaic.version = 11 : i64} {
  func.func @kernel(%arg0: i32, %arg1: memref<1x8x32xf32, #tpu.memory_space<vmem>>, %arg2: memref<1x8x32xf32, #tpu.memory_space<vmem>>, %arg3: memref<1x8x32xf32, #tpu.memory_space<vmem>>, %arg4: memref<1x4x8x8xf32, #tpu.memory_space<vmem>>, %arg5: memref<4x32x8xf32, #tpu.memory_space<vmem>>, %arg6: memref<4x32x8xf32, #tpu.memory_space<vmem>>, %arg7: memref<4x32x8xf32, #tpu.memory_space<vmem>>, %arg8: memref<4x1x8xf32, #tpu.memory_space<vmem>>, %arg9: memref<4x1x8xf32, #tpu.memory_space<vmem>>, %arg10: memref<4x1x8xf32, #tpu.memory_space<vmem>>, %arg11: memref<4x8x32xf32, #tpu.memory_space<vmem>>, %arg12: memref<1x32xf32, #tpu.memory_space<vmem>>, %arg13: memref<1x8x32xf32, #tpu.memory_space<vmem>>) attributes {dimension_semantics = [#tpu.dimension_semantics<parallel>], iteration_bounds = array<i64: 2>, scalar_prefetch = 0 : i64, scratch_operands = 0 : i64, tpu.core_type = #tpu.core_type<tc>, window_params = [{transform_indices = @transform_0, window_bounds = array<i64: 1, 8, 32>}, {transform_indices = @transform_1, window_bounds = array<i64: 1, 8, 32>}, {transform_indices = @transform_2, window_bounds = array<i64: 1, 8, 32>}, {transform_indices = @transform_3, window_bounds = array<i64: 1, 4, 8, 8>}, {pipeline_mode = #tpu.pipeline_mode<synchronous>, transform_indices = @transform_4, window_bounds = array<i64: 4, 32, 8>}, {pipeline_mode = #tpu.pipeline_mode<synchronous>, transform_indices = @transform_5, window_bounds = array<i64: 4, 32, 8>}, {pipeline_mode = #tpu.pipeline_mode<synchronous>, transform_indices = @transform_6, window_bounds = array<i64: 4, 32, 8>}, {pipeline_mode = #tpu.pipeline_mode<synchronous>, transform_indices = @transform_7, window_bounds = array<i64: 4, 1, 8>}, {pipeline_mode = #tpu.pipeline_mode<synchronous>, transform_indices = @transform_8, window_bounds = array<i64: 4, 1, 8>}, {pipeline_mode = #tpu.pipeline_mode<synchronous>, transform_indices = @transform_9, window_bounds = array<i64: 4, 1, 8>}, {pipeline_mode = #tpu.pipeline_mode<synchronous>, transform_indices = @transform_10, window_bounds = array<i64: 4, 8, 32>}, {pipeline_mode = #tpu.pipeline_mode<synchronous>, transform_indices = @transform_11, window_bounds = array<i64: 1, 32>}, {transform_indices = @transform_12, window_bounds = array<i64: 1, 8, 32>}]} {
    %c0 = arith.constant 0 : index
    %c0_0 = arith.constant 0 : index
    %c0_1 = arith.constant 0 : index
    %0 = vector.load %arg1[%c0, %c0_0, %c0_1] : memref<1x8x32xf32, #tpu.memory_space<vmem>>, vector<1x8x32xf32>
    %1 = vector.shape_cast %0 : vector<1x8x32xf32> to vector<8x32xf32>
    %c0_2 = arith.constant 0 : index
    %c0_3 = arith.constant 0 : index
    %c0_4 = arith.constant 0 : index
    %2 = vector.load %arg2[%c0_2, %c0_3, %c0_4] : memref<1x8x32xf32, #tpu.memory_space<vmem>>, vector<1x8x32xf32>
    %3 = vector.shape_cast %2 : vector<1x8x32xf32> to vector<8x32xf32>
    %c0_5 = arith.constant 0 : index
    %c0_6 = arith.constant 0 : index
    %c0_7 = arith.constant 0 : index
    %4 = vector.load %arg3[%c0_5, %c0_6, %c0_7] : memref<1x8x32xf32, #tpu.memory_space<vmem>>, vector<1x8x32xf32>
    %5 = vector.shape_cast %4 : vector<1x8x32xf32> to vector<8x32xf32>
    %6 = vector.shape_cast %1 : vector<8x32xf32> to vector<1x8x32xf32>
    %7 = vector.shape_cast %6 : vector<1x8x32xf32> to vector<1x8x32xf32>
    %8 = vector.broadcast %7 : vector<1x8x32xf32> to vector<4x8x32xf32>
    %c0_8 = arith.constant 0 : index
    %c0_9 = arith.constant 0 : index
    %c0_10 = arith.constant 0 : index
    %9 = vector.load %arg5[%c0_8, %c0_9, %c0_10] : memref<4x32x8xf32, #tpu.memory_space<vmem>>, vector<4x32x8xf32>
    "tpu.trace_start"() <{level = 10 : i32, message = "hnd,hdk->hnk"}> : () -> ()
    %cst = arith.constant dense<0.000000e+00> : vector<4x8x8xf32>
    %10 = tpu.matmul %8, %9, %cst {dimension_numbers = #tpu.dot_dimension_numbers<[2], [1], [1], [2], [0, 0, 0, 1, 1, 2], [0], [0]>} : vector<4x8x32xf32>, vector<4x32x8xf32>, vector<4x8x8xf32> -> vector<4x8x8xf32>
    "tpu.trace_stop"() : () -> ()
    %c0_11 = arith.constant 0 : index
    %c0_12 = arith.constant 0 : index
    %c0_13 = arith.constant 0 : index
    %11 = vector.load %arg8[%c0_11, %c0_12, %c0_13] : memref<4x1x8xf32, #tpu.memory_space<vmem>>, vector<4x1x8xf32>
    %12 = vector.broadcast %11 : vector<4x1x8xf32> to vector<4x8x8xf32>
    %13 = arith.addf %10, %12 : vector<4x8x8xf32>
    %14 = vector.shape_cast %3 : vector<8x32xf32> to vector<1x8x32xf32>
    %15 = vector.shape_cast %14 : vector<1x8x32xf32> to vector<1x8x32xf32>
    %16 = vector.broadcast %15 : vector<1x8x32xf32> to vector<4x8x32xf32>
    %c0_14 = arith.constant 0 : index
    %c0_15 = arith.constant 0 : index
    %c0_16 = arith.constant 0 : index
    %17 = vector.load %arg6[%c0_14, %c0_15, %c0_16] : memref<4x32x8xf32, #tpu.memory_space<vmem>>, vector<4x32x8xf32>
    "tpu.trace_start"() <{level = 10 : i32, message = "hnd,hdk->hnk"}> : () -> ()
    %cst_17 = arith.constant dense<0.000000e+00> : vector<4x8x8xf32>
    %18 = tpu.matmul %16, %17, %cst_17 {dimension_numbers = #tpu.dot_dimension_numbers<[2], [1], [1], [2], [0, 0, 0, 1, 1, 2], [0], [0]>} : vector<4x8x32xf32>, vector<4x32x8xf32>, vector<4x8x8xf32> -> vector<4x8x8xf32>
    "tpu.trace_stop"() : () -> ()
    %c0_18 = arith.constant 0 : index
    %c0_19 = arith.constant 0 : index
    %c0_20 = arith.constant 0 : index
    %19 = vector.load %arg9[%c0_18, %c0_19, %c0_20] : memref<4x1x8xf32, #tpu.memory_space<vmem>>, vector<4x1x8xf32>
    %20 = vector.broadcast %19 : vector<4x1x8xf32> to vector<4x8x8xf32>
    %21 = arith.addf %18, %20 : vector<4x8x8xf32>
    %22 = vector.shape_cast %5 : vector<8x32xf32> to vector<1x8x32xf32>
    %23 = vector.shape_cast %22 : vector<1x8x32xf32> to vector<1x8x32xf32>
    %24 = vector.broadcast %23 : vector<1x8x32xf32> to vector<4x8x32xf32>
    %c0_21 = arith.constant 0 : index
    %c0_22 = arith.constant 0 : index
    %c0_23 = arith.constant 0 : index
    %25 = vector.load %arg7[%c0_21, %c0_22, %c0_23] : memref<4x32x8xf32, #tpu.memory_space<vmem>>, vector<4x32x8xf32>
    "tpu.trace_start"() <{level = 10 : i32, message = "hnd,hdk->hnk"}> : () -> ()
    %cst_24 = arith.constant dense<0.000000e+00> : vector<4x8x8xf32>
    %26 = tpu.matmul %24, %25, %cst_24 {dimension_numbers = #tpu.dot_dimension_numbers<[2], [1], [1], [2], [0, 0, 0, 1, 1, 2], [0], [0]>} : vector<4x8x32xf32>, vector<4x32x8xf32>, vector<4x8x8xf32> -> vector<4x8x8xf32>
    "tpu.trace_stop"() : () -> ()
    %c0_25 = arith.constant 0 : index
    %c0_26 = arith.constant 0 : index
    %c0_27 = arith.constant 0 : index
    %27 = vector.load %arg10[%c0_25, %c0_26, %c0_27] : memref<4x1x8xf32, #tpu.memory_space<vmem>>, vector<4x1x8xf32>
    %28 = vector.broadcast %27 : vector<4x1x8xf32> to vector<4x8x8xf32>
    %29 = arith.addf %26, %28 : vector<4x8x8xf32>
    "tpu.trace_start"() <{level = 10 : i32, message = "hqd,hkd->hqk"}> : () -> ()
    %cst_28 = arith.constant dense<0.000000e+00> : vector<4x8x8xf32>
    %30 = tpu.matmul %13, %21, %cst_28 {dimension_numbers = #tpu.dot_dimension_numbers<[2], [2], [1], [1], [0, 0, 0, 1, 1, 1], [0], [0]>} : vector<4x8x8xf32>, vector<4x8x8xf32>, vector<4x8x8xf32> -> vector<4x8x8xf32>
    "tpu.trace_stop"() : () -> ()
    %cst_29 = arith.constant 0.353553385 : f32
    %31 = vector.broadcast %cst_29 : f32 to vector<4x8x8xf32>
    %32 = arith.mulf %30, %31 : vector<4x8x8xf32>
    %c0_30 = arith.constant 0 : index
    %c0_31 = arith.constant 0 : index
    %c0_32 = arith.constant 0 : index
    %c0_33 = arith.constant 0 : index
    %33 = vector.load %arg4[%c0_30, %c0_31, %c0_32, %c0_33] : memref<1x4x8x8xf32, #tpu.memory_space<vmem>>, vector<1x4x8x8xf32>
    %34 = vector.shape_cast %33 : vector<1x4x8x8xf32> to vector<4x8x8xf32>
    %cst_34 = arith.constant 9.99999997E-7 : f32
    %35 = vector.broadcast %cst_34 : f32 to vector<4x8x8xf32>
    %36 = arith.maximumf %34, %35 : vector<4x8x8xf32>
    %37 = math.log %36 : vector<4x8x8xf32>
    %38 = arith.addf %37, %32 : vector<4x8x8xf32>
    %cst_35 = arith.constant dense<0xFF800000> : vector<4x8xf32>
    %39 = vector.multi_reduction <maximumf>, %38, %cst_35 [2] : vector<4x8x8xf32> to vector<4x8xf32>
    %40 = vector.shape_cast %39 : vector<4x8xf32> to vector<4x8x1xf32>
    %41 = vector.broadcast %40 : vector<4x8x1xf32> to vector<4x8x8xf32>
    %42 = arith.subf %38, %41 : vector<4x8x8xf32>
    %43 = math.exp %42 : vector<4x8x8xf32>
    %cst_36 = arith.constant dense<0.000000e+00> : vector<4x8xf32>
    %44 = vector.multi_reduction <add>, %43, %cst_36 [2] : vector<4x8x8xf32> to vector<4x8xf32>
    %45 = vector.shape_cast %44 : vector<4x8xf32> to vector<4x8x1xf32>
    %46 = vector.broadcast %45 : vector<4x8x1xf32> to vector<4x8x8xf32>
    %47 = arith.divf %43, %46 : vector<4x8x8xf32>
    "tpu.trace_start"() <{level = 10 : i32, message = "hqk,hkd->hqd"}> : () -> ()
    %cst_37 = arith.constant dense<0.000000e+00> : vector<4x8x8xf32>
    %48 = tpu.matmul %47, %29, %cst_37 {dimension_numbers = #tpu.dot_dimension_numbers<[2], [1], [1], [2], [0, 0, 0, 1, 1, 2], [0], [0]>} : vector<4x8x8xf32>, vector<4x8x8xf32>, vector<4x8x8xf32> -> vector<4x8x8xf32>
    "tpu.trace_stop"() : () -> ()
    %c0_38 = arith.constant 0 : index
    %c0_39 = arith.constant 0 : index
    %c0_40 = arith.constant 0 : index
    %49 = vector.load %arg11[%c0_38, %c0_39, %c0_40] : memref<4x8x32xf32, #tpu.memory_space<vmem>>, vector<4x8x32xf32>
    "tpu.trace_start"() <{level = 10 : i32, message = "hnd,hde->hne"}> : () -> ()
    %cst_41 = arith.constant dense<0.000000e+00> : vector<4x8x32xf32>
    %50 = tpu.matmul %48, %49, %cst_41 {dimension_numbers = #tpu.dot_dimension_numbers<[2], [1], [1], [2], [0, 0, 0, 1, 1, 2], [0], [0]>} : vector<4x8x8xf32>, vector<4x8x32xf32>, vector<4x8x32xf32> -> vector<4x8x32xf32>
    "tpu.trace_stop"() : () -> ()
    %cst_42 = arith.constant dense<0.000000e+00> : vector<8x32xf32>
    %51 = vector.multi_reduction <add>, %50, %cst_42 [0] : vector<4x8x32xf32> to vector<8x32xf32>
    %c0_43 = arith.constant 0 : index
    %c0_44 = arith.constant 0 : index
    %52 = vector.load %arg12[%c0_43, %c0_44] : memref<1x32xf32, #tpu.memory_space<vmem>>, vector<1x32xf32>
    %53 = vector.broadcast %52 : vector<1x32xf32> to vector<8x32xf32>
    %54 = arith.addf %51, %53 : vector<8x32xf32>
    %c0_45 = arith.constant 0 : index
    %c0_46 = arith.constant 0 : index
    %c0_47 = arith.constant 0 : index
    %55 = vector.load %arg13[%c0_45, %c0_46, %c0_47] : memref<1x8x32xf32, #tpu.memory_space<vmem>>, vector<1x8x32xf32>
    %56 = vector.shape_cast %55 : vector<1x8x32xf32> to vector<8x32xf32>
    %57 = vector.shape_cast %54 : vector<8x32xf32> to vector<1x8x32xf32>
    tpu.vector_store %arg13[%c0_45, %c0_46, %c0_47], %57 {strides = array<i32>} : memref<1x8x32xf32, #tpu.memory_space<vmem>>, vector<1x8x32xf32>,
    return
  }
  func.func @transform_0(%arg0: i32) -> (i32, i32, i32) {
    %c0_i32 = arith.constant 0 : i32
    %c0_i32_0 = arith.constant 0 : i32
    %c0_i32_1 = arith.constant 0 : i32
    return %arg0, %c0_i32, %c0_i32_0 : i32, i32, i32
  }
  func.func @transform_1(%arg0: i32) -> (i32, i32, i32) {
    %c0_i32 = arith.constant 0 : i32
    %c0_i32_0 = arith.constant 0 : i32
    %c0_i32_1 = arith.constant 0 : i32
    return %arg0, %c0_i32, %c0_i32_0 : i32, i32, i32
  }
  func.func @transform_2(%arg0: i32) -> (i32, i32, i32) {
    %c0_i32 = arith.constant 0 : i32
    %c0_i32_0 = arith.constant 0 : i32
    %c0_i32_1 = arith.constant 0 : i32
    return %arg0, %c0_i32, %c0_i32_0 : i32, i32, i32
  }
  func.func @transform_3(%arg0: i32) -> (i32, i32, i32, i32) {
    %c0_i32 = arith.constant 0 : i32
    %c0_i32_0 = arith.constant 0 : i32
    %c0_i32_1 = arith.constant 0 : i32
    %c0_i32_2 = arith.constant 0 : i32
    return %arg0, %c0_i32, %c0_i32_0, %c0_i32_1 : i32, i32, i32, i32
  }
  func.func @transform_4(%arg0: i32) -> (i32, i32, i32) {
    %c0_i32 = arith.constant 0 : i32
    %c0_i32_0 = arith.constant 0 : i32
    %c0_i32_1 = arith.constant 0 : i32
    %c0_i32_2 = arith.constant 0 : i32
    return %c0_i32, %c0_i32_0, %c0_i32_1 : i32, i32, i32
  }
  func.func @transform_5(%arg0: i32) -> (i32, i32, i32) {
    %c0_i32 = arith.constant 0 : i32
    %c0_i32_0 = arith.constant 0 : i32
    %c0_i32_1 = arith.constant 0 : i32
    %c0_i32_2 = arith.constant 0 : i32
    return %c0_i32, %c0_i32_0, %c0_i32_1 : i32, i32, i32
  }
  func.func @transform_6(%arg0: i32) -> (i32, i32, i32) {
    %c0_i32 = arith.constant 0 : i32
    %c0_i32_0 = arith.constant 0 : i32
    %c0_i32_1 = arith.constant 0 : i32
    %c0_i32_2 = arith.constant 0 : i32
    return %c0_i32, %c0_i32_0, %c0_i32_1 : i32, i32, i32
  }
  func.func @transform_7(%arg0: i32) -> (i32, i32, i32) {
    %c0_i32 = arith.constant 0 : i32
    %c0_i32_0 = arith.constant 0 : i32
    %c0_i32_1 = arith.constant 0 : i32
    %c0_i32_2 = arith.constant 0 : i32
    return %c0_i32, %c0_i32_0, %c0_i32_1 : i32, i32, i32
  }
  func.func @transform_8(%arg0: i32) -> (i32, i32, i32) {
    %c0_i32 = arith.constant 0 : i32
    %c0_i32_0 = arith.constant 0 : i32
    %c0_i32_1 = arith.constant 0 : i32
    %c0_i32_2 = arith.constant 0 : i32
    return %c0_i32, %c0_i32_0, %c0_i32_1 : i32, i32, i32
  }
  func.func @transform_9(%arg0: i32) -> (i32, i32, i32) {
    %c0_i32 = arith.constant 0 : i32
    %c0_i32_0 = arith.constant 0 : i32
    %c0_i32_1 = arith.constant 0 : i32
    %c0_i32_2 = arith.constant 0 : i32
    return %c0_i32, %c0_i32_0, %c0_i32_1 : i32, i32, i32
  }
  func.func @transform_10(%arg0: i32) -> (i32, i32, i32) {
    %c0_i32 = arith.constant 0 : i32
    %c0_i32_0 = arith.constant 0 : i32
    %c0_i32_1 = arith.constant 0 : i32
    %c0_i32_2 = arith.constant 0 : i32
    return %c0_i32, %c0_i32_0, %c0_i32_1 : i32, i32, i32
  }
  func.func @transform_11(%arg0: i32) -> (i32, i32) {
    %c0_i32 = arith.constant 0 : i32
    %c0_i32_0 = arith.constant 0 : i32
    %c0_i32_1 = arith.constant 0 : i32
    return %c0_i32, %c0_i32_0 : i32, i32
  }
  func.func @transform_12(%arg0: i32) -> (i32, i32, i32) {
    %c0_i32 = arith.constant 0 : i32
    %c0_i32_0 = arith.constant 0 : i32
    %c0_i32_1 = arith.constant 0 : i32
    return %arg0, %c0_i32, %c0_i32_0 : i32, i32, i32
  }
}

</mosaic_0001>

<bundles_post_ra>
// kernel: _box_mha_forward.1
= control target key start
LH: loop header
LB: loop body
LE: loop exit
PB: predicated region body
PF: predicated region fallthrough
CT: control target
= control target key end

     0   :  { %s3581_s0 = inlined_call_operand.vmem [shape: f32[2,8,32], index: 0, kind: input, shape index: {}]   ;;  %s3582_s1 = inlined_call_operand.vmem [shape: f32[2,8,32], index: 1, kind: input, shape index: {}]   ;;  %s3583_s2 = inlined_call_operand.vmem [shape: f32[2,8,32], index: 2, kind: input, shape index: {}]   ;;  %s3584_s3 = inlined_call_operand.vmem [shape: f32[2,4,8,8], index: 3, kind: input, shape index: {}]   ;;  %s3585_s4 = inlined_call_operand.vmem [shape: f32[4,32,8], index: 4, kind: input, shape index: {}]   ;;  %s3586_s5 = inlined_call_operand.vmem [shape: f32[4,32,8], index: 5, kind: input, shape index: {}]   ;;  %s3587_s6 = inlined_call_operand.vmem [shape: f32[4,32,8], index: 6, kind: input, shape index: {}]   ;;  %s3588_s7 = inlined_call_operand.vmem [shape: f32[4,1,8], index: 7, kind: input, shape index: {}]   ;;  %s3589_s8 = inlined_call_operand.vmem [shape: f32[4,1,8], index: 8, kind: input, shape index: {}]   ;;  %s3590_s9 = inlined_call_operand.vmem [shape: f32[4,1,8], index: 9, kind: input, shape index: {}]   ;;  %s3591_s10 = inlined_call_operand.vmem [shape: f32[4,8,32], index: 10, kind: input, shape index: {}]   ;;  %s3592_s11 = inlined_call_operand.vmem [shape: f32[1,32], index: 11, kind: input, shape index: {}]   ;;  %s3593_s12 = inlined_call_operand.hbm [shape: f32[2,8,32], index: 12, kind: output, shape index: {}]  }
   0x1   :  { %3595 = sst [smem:[#allocation7_spill]] %s3581_s0 }
   0x2   :  { %3596 = sst [smem:[#allocation8_spill]] %s3582_s1 }
   0x3   :  { %17 = vsyncpa [#allocation3], 0 }
   0x4   :  { %19 = vsyncpa [#allocation3 + $0x1], 0  ;;  %s3137_s21 = smov 0   ;;  %s3139_s22 = smov 0  }
   0x5   :  { %s3141_s23 = smov 0   ;;  %s3143_s24 = smov 0  }
   0x6 LB: > { %3597 = sst [smem:[#allocation5_spill]] %s3062_s23  ;;  %s3158_s25 = sadd.s32 4294967295, %s3066_s24   ;;  %s3066_s24 = sphi %s3143_s24, %s3607_s24   ;;  %s3062_s23 = sphi %s3141_s23, %s3604_s23   ;;  %s3058_s22 = sphi %s3139_s22, %s3606_s22   ;;  %s3054_s21 = sphi %s3137_s21, %s3605_s21  }
   0x7   : > { %s2534_s26 = sadd.s32 4294967294, %s3066_s24   ;;  %s3162_s27 = sadd.s32 1, %s3066_s24  }
   0x8   : > { %s304_s28 = sadd.s32 1, %s3062_s23  ;;  %s301_s29 = ssub.s32 %s3066_s24, %s3162_s27 }
   0x9   : > { %p314_p0 = scmp.ne.s32.totalorder %s3062_s23, %s3058_s22  ;;  %p302_p1 = scmp.eq.s32.totalorder %s301_s29, 0 }
   0xa   : > { %p315_p2 = scmp.eq.s32.totalorder %s3158_s25, 1  ;;  %p320_p3 = scmp.ne.s32.totalorder %s3058_s22, %s3054_s21 }
   0xb   : > { %p321_p4 = scmp.eq.s32.totalorder %s2534_s26, 1  ;;  %p2537_p7 = scmp.ge.s32.totalorder %s3066_s24, 1 }
   0xc   : > { %s3173_s30 = scalar_select %p302_p1, %s3062_s23, %s304_s28  }
   0xd   : > { %p3175_p5 = por %p315_p2, %p314_p0  ;;  %p3179_p6 = por %p321_p4, %p320_p3 }
   0xe   : > { %3598 = sst [smem:[#allocation6_spill]] %s3173_s30  ;;  %p392_p8 = scmp.lt.s32.totalorder %s3066_s24, 3 }
  0x10   : > { %p393_p9 = pnand %p2537_p7, %p392_p8 }
  0x11   : > { %v466_v0 = vld [vmem:[%s3585_s4] sm:$0xff] (!%p393_p9)  ;;  %v467_v1 = vld [vmem:[%s3585_s4 + $0x8] sm:$0xff] (!%p393_p9)  ;;  %v3068_v3 = vmov (!%p393_p9), 0.0|0.0   ;;  %v468_v6 = vld [vmem:[%s3585_s4 + $0x10] sm:$0xff] (!%p393_p9)  ;;  %p446_p10 = scmp.lt.s32.totalorder (!%p393_p9), %s3158_s25, 1  ;;  %vm3069_vm0 = vmmov (!%p393_p9), 0  }
  0x12   : > { %396 = sbr.rel (%p393_p9) target bundleno = 1248 (0x4e0), region = 68  ;;  %v470_v2 = vld [vmem:[%s3585_s4 + $0x20] sm:$0xff] (!%p393_p9)  ;;  %2866 = vmatprep.subr.bf16.mxu0 (!%p393_p9), %v3068_v3  ;;  %2872 = vmatprep.subr.bf16.mxu1 (!%p393_p9), %v3068_v3  ;;  %v2867_v4 = vpack.c.bf16 (!%p393_p9), %v467_v1, %v466_v0  ;;  %v471_v5 = vld [vmem:[%s3585_s4 + $0x28] sm:$0xff] (!%p393_p9)  ;;  %v469_v7 = vld [vmem:[%s3585_s4 + $0x18] sm:$0xff] (!%p393_p9)  ;;  %v3070_v11 = vmov (!%p393_p9), 0.0   ;;  %s3601_s0 = sld [smem:[#allocation7_spill]] (!%p393_p9) }
  0x13   : > { %v2873_v8 = vpack.c.bf16 (!%p393_p9), %v471_v5, %v470_v2  ;;  %v472_v9 = vld [vmem:[%s3585_s4 + $0x30] sm:$0xff] (!%p393_p9)  ;;  %v473_v10 = vld [vmem:[%s3585_s4 + $0x38] sm:$0xff] (!%p393_p9)  ;;  %2682 = vmatprep.mubr.msk.f32.mxu0 (!%p393_p9), %vm3069_vm0, %v3070_v11  ;;  %2693 = vmatprep.mubr.msk.f32.mxu1 (!%p393_p9), %vm3069_vm0, %v3070_v11  ;;  %v2870_v12 = vpack.c.bf16 (!%p393_p9), %v469_v7, %v468_v6  ;;  %v474_v14 = vld [vmem:[%s3585_s4 + $0x40] sm:$0xff] (!%p393_p9)  ;;  %vm510_vm1 = vcmask (!%p393_p9), 261120   ;;  %s3602_s1 = sld [smem:[#allocation8_spill]] (!%p393_p9)  ;;  %vm1448_vm2 = vcmask (!%p393_p9), 64512  }
  0x14   : > { %2868 = vmatpush3.bf16.msra.mxu0 (!%p393_p9), %v2867_v4  ;;  %v2876_v13 = vpack.c.bf16 (!%p393_p9), %v473_v10, %v472_v9  ;;  %v475_v15 = vld [vmem:[%s3585_s4 + $0x48] sm:$0xff] (!%p393_p9)  ;;  %v478_v16 = vld [vmem:[%s3585_s4 + $0x60] sm:$0xff] (!%p393_p9)  ;;  %v476_v21 = vld [vmem:[%s3585_s4 + $0x50] sm:$0xff] (!%p393_p9)  ;;  %s2586_s15 = sshll.u32 (!%p393_p9), %s3158_s25, 7 }
  0x15   : > { %2874 = vmatpush3.bf16.msra.mxu1 (!%p393_p9), %v2873_v8  ;;  %2869 = vmatprep.subr.bf16.mxu0 (!%p393_p9), %v3068_v3  ;;  %v479_v17 = vld [vmem:[%s3585_s4 + $0x68] sm:$0xff] (!%p393_p9)  ;;  %v2879_v19 = vpack.c.bf16 (!%p393_p9), %v475_v15, %v474_v14  ;;  %v477_v22 = vld [vmem:[%s3585_s4 + $0x58] sm:$0xff] (!%p393_p9)  ;;  %v480_v23 = vld [vmem:[%s3585_s4 + $0x70] sm:$0xff] (!%p393_p9)  ;;  %s3538_s18 = scalar_lea.hbm (!%p393_p9), %s3593_s12, %s2586_s15 }
  0x16   : > { %2875 = vmatprep.subr.bf16.mxu1 (!%p393_p9), %v3068_v3  ;;  %v2885_v20 = vpack.c.bf16 (!%p393_p9), %v479_v17, %v478_v16  ;;  %v481_v24 = vld [vmem:[%s3585_s4 + $0x78] sm:$0xff] (!%p393_p9)  ;;  %v2882_v25 = vpack.c.bf16 (!%p393_p9), %v477_v22, %v476_v21  ;;  %v794_v27 = vld [vmem:[%s3586_s5] sm:$0xff] (!%p393_p9)  ;;  %v795_v28 = vld [vmem:[%s3586_s5 + $0x8] sm:$0xff] (!%p393_p9) }
  0x17   : > { %v2888_v26 = vpack.c.bf16 (!%p393_p9), %v481_v24, %v480_v23  ;;  %v798_v29 = vld [vmem:[%s3586_s5 + $0x20] sm:$0xff] (!%p393_p9)  ;;  %v799_v30 = vld [vmem:[%s3586_s5 + $0x28] sm:$0xff] (!%p393_p9)  ;;  %v2891_v31 = vpack.c.bf16 (!%p393_p9), %v795_v28, %v794_v27  ;;  %v796_v33 = vld [vmem:[%s3586_s5 + $0x10] sm:$0xff] (!%p393_p9) }
  0x18   : > { %2871 = vmatpush3.bf16.msra.mxu0 (!%p393_p9), %v2870_v12  ;;  %v2897_v32 = vpack.c.bf16 (!%p393_p9), %v799_v30, %v798_v29  ;;  %v797_v34 = vld [vmem:[%s3586_s5 + $0x18] sm:$0xff] (!%p393_p9)  ;;  %v800_v35 = vld [vmem:[%s3586_s5 + $0x30] sm:$0xff] (!%p393_p9)  ;;  %v802_v39 = vld [vmem:[%s3586_s5 + $0x40] sm:$0xff] (!%p393_p9) }
  0x19   : > { %s3217_s26 = scalar_select %p446_p10, %s3158_s25, 1  ;;  %2877 = vmatpush3.bf16.msra.mxu1 %v2876_v13  ;;  %2878 = vmatprep.subr.bf16.mxu0 %v3068_v3  ;;  %v801_v36 = vld [vmem:[%s3586_s5 + $0x38] sm:$0xff]  ;;  %v2894_v37 = vpack.c.bf16 %v797_v34, %v796_v33  ;;  %v803_v40 = vld [vmem:[%s3586_s5 + $0x48] sm:$0xff]  ;;  %v806_v41 = vld [vmem:[%s3586_s5 + $0x60] sm:$0xff] }
  0x1a   : > { %2884 = vmatprep.subr.bf16.mxu1 %v3068_v3  ;;  %v2900_v38 = vpack.c.bf16 %v801_v36, %v800_v35  ;;  %v807_v42 = vld [vmem:[%s3586_s5 + $0x68] sm:$0xff]  ;;  %v2903_v44 = vpack.c.bf16 %v803_v40, %v802_v39  ;;  %v804_v46 = vld [vmem:[%s3586_s5 + $0x50] sm:$0xff]  ;;  %v805_v47 = vld [vmem:[%s3586_s5 + $0x58] sm:$0xff]  ;;  %s3071_s25 = smov [#allocation2]  }
  0x1b   : > { %s3228_s16 = sshll.u32 %s3217_s26, 3  ;;  %v2909_v45 = vpack.c.bf16 %v807_v42, %v806_v41  ;;  %v808_v48 = vld [vmem:[%s3586_s5 + $0x70] sm:$0xff]  ;;  %v809_v49 = vld [vmem:[%s3586_s5 + $0x78] sm:$0xff]  ;;  %v2906_v50 = vpack.c.bf16 %v805_v47, %v804_v46  ;;  %v1121_v52 = vld [vmem:[%s3587_s6] sm:$0xff]  ;;  %s3008_s19 = sshll.u32 %s3071_s25, 4  ;;  %s3009_s19 = int_to_ptr.vmem [resolvable:$false] %s3008_s19 }
  0x1c   : > { %s449_s30 = scalar_lea.vmem %s3601_s0, %s3228_s16  ;;  %v2912_v51 = vpack.c.bf16 %v809_v49, %v808_v48  ;;  %v1122_v53 = vld [vmem:[%s3587_s6 + $0x8] sm:$0xff]  ;;  %v1125_v54 = vld [vmem:[%s3587_s6 + $0x20] sm:$0xff]  ;;  %v1123_v58 = vld [vmem:[%s3587_s6 + $0x10] sm:$0xff] }
  0x1d   : > { %v463_v18 = vld [vmem:[%s449_s30] sm:$0xff]  ;;  %s453_s30 = scalar_lea.vmem %s3602_s1, %s3228_s16  ;;  %v1126_v55 = vld [vmem:[%s3587_s6 + $0x28] sm:$0xff]  ;;  %v2915_v56 = vpack.c.bf16 %v1122_v53, %v1121_v52  ;;  %v1124_v59 = vld [vmem:[%s3587_s6 + $0x18] sm:$0xff]  ;;  %s457_s1 = scalar_lea.vmem %s3583_s2, %s3228_s16 }
  0x1e   : > { %2683 = vmatmul.mubr.msk.f32.vlgmr.msra.gmra.mrb[0].mxu0 %vm510_vm1, %v463_v18  ;;  %2694 = vmatmul.mubr.msk.f32.vlgmr.msra.gmra.mrb[0].mxu1 %vm510_vm1, %v463_v18  ;;  %v464_v43 = vld [vmem:[%s453_s30] sm:$0xff]  ;;  %v2921_v57 = vpack.c.bf16 %v1126_v55, %v1125_v54  ;;  %v1127_v60 = vld [vmem:[%s3587_s6 + $0x30] sm:$0xff]  ;;  %v2918_v61 = vpack.c.bf16 %v1124_v59, %v1123_v58  ;;  %v1128_v62 = vld [vmem:[%s3587_s6 + $0x38] sm:$0xff]  ;;  %s2589_s30 = sshll.u32 %s3217_s26, 5 }
  0x1f   : > { %2880 = vmatpush3.bf16.msra.mxu0 %v2879_v19  ;;  %2886 = vmatpush3.bf16.msra.mxu1 %v2885_v20  ;;  %v2924_v63 = vpack.c.bf16 %v1128_v62, %v1127_v60  ;;  %v1129_v0 = vld [vmem:[%s3587_s6 + $0x40] sm:$0xff]  ;;  %v1130_v1 = vld [vmem:[%s3587_s6 + $0x48] sm:$0xff]  ;;  %v1131_v8 = vld [vmem:[%s3587_s6 + $0x50] sm:$0xff]  ;;  %s462_s20 = scalar_lea.vmem %s3584_s3, %s2589_s30 }
  0x20   : > { %2881 = vmatprep.subr.bf16.mxu0 %v3068_v3  ;;  %2887 = vmatprep.subr.bf16.mxu1 %v3068_v3  ;;  %v1133_v2 = vld [vmem:[%s3587_s6 + $0x60] sm:$0xff]  ;;  %v2927_v5 = vpack.c.bf16 %v1130_v1, %v1129_v0  ;;  %v1134_v6 = vld [vmem:[%s3587_s6 + $0x68] sm:$0xff]  ;;  %v1132_v9 = vld [vmem:[%s3587_s6 + $0x58] sm:$0xff] }
  0x21   : > { %2704 = vmatprep.mubr.msk.f32.mxu0 %vm3069_vm0, %v3070_v11  ;;  %2715 = vmatprep.mubr.msk.f32.mxu1 %vm3069_vm0, %v3070_v11  ;;  %v465_v4 = vld [vmem:[%s457_s1] sm:$0xff]  ;;  %v2933_v7 = vpack.c.bf16 %v1134_v6, %v1133_v2  ;;  %v1135_v10 = vld [vmem:[%s3587_s6 + $0x70] sm:$0xff]  ;;  %v2930_v12 = vpack.c.bf16 %v1132_v9, %v1131_v8  ;;  %v1136_v13 = vld [vmem:[%s3587_s6 + $0x78] sm:$0xff] }
  0x22   : > { %v2936_v14 = vpack.c.bf16 %v1136_v13, %v1135_v10  ;;  %v2552_v22 = vld [vmem:[%s3589_s8] ss:$0 sm:$0xff]  ;;  %v2553_v23 = vld [vmem:[%s3589_s8 + $0x1] ss:$0 sm:$0xff]  ;;  %v2554_v34 = vld [vmem:[%s3589_s8 + $0x2] ss:$0 sm:$0xff] }
  0x23   : > { %2883 = vmatpush3.bf16.msra.mxu0 %v2882_v25  ;;  %2889 = vmatpush3.bf16.msra.mxu1 %v2888_v26  ;;  %v2544_v25 = vld [vmem:[%s3588_s7] ss:$0 sm:$0xff]  ;;  %v2545_v29 = vld [vmem:[%s3588_s7 + $0x1] ss:$0 sm:$0xff]  ;;  %v2555_v35 = vld [vmem:[%s3589_s8 + $0x3] ss:$0 sm:$0xff] }
  0x24   : > { %2890 = vmatprep.subr.bf16.mxu0 %v3068_v3  ;;  %2896 = vmatprep.subr.bf16.mxu1 %v3068_v3  ;;  %v2547_v41 = vld [vmem:[%s3588_s7 + $0x3] ss:$0 sm:$0xff]  ;;  %v2560_v46 = vld [vmem:[%s3590_s9] ss:$0 sm:$0xff]  ;;  %v2561_v47 = vld [vmem:[%s3590_s9 + $0x1] ss:$0 sm:$0xff] }
  0x25   : > { %v1757_v58 = vld [vmem:[%s462_s20] sm:$0xff]  ;;  %v1758_v59 = vld [vmem:[%s462_s20 + $0x8] sm:$0xff]  ;;  %v1759_v62 = vld [vmem:[%s462_s20 + $0x10] sm:$0xff] }
  0x26   : > { %2705 = vmatmul.mubr.msk.f32.vlgmr.msra.gmra.mrb[2].mxu0 %vm510_vm1, %v463_v18  ;;  %2716 = vmatmul.mubr.msk.f32.vlgmr.msra.gmra.mrb[2].mxu1 %vm510_vm1, %v463_v18  ;;  %v1761_v60 = vmax.f32 %v1757_v58, 1e-06  ;;  %v1763_v0 = vmax.f32 %v1759_v62, 1e-06 }
  0x27   : > { %2892 = vmatpush3.bf16.msra.mxu0 %v2891_v31  ;;  %2898 = vmatpush3.bf16.msra.mxu1 %v2897_v32 }
  0x28   : > { %2893 = vmatprep.subr.bf16.mxu0 %v3068_v3  ;;  %2899 = vmatprep.subr.bf16.mxu1 %v3068_v3  ;;  %2980 = vlog2.f32 %v1761_v60 }
  0x29   : > { %2726 = vmatprep.mubr.msk.f32.mxu0 %vm3069_vm0, %v3070_v11  ;;  %2737 = vmatprep.mubr.msk.f32.mxu1 %vm3069_vm0, %v3070_v11 }
  0x2b   : > { %2895 = vmatpush3.bf16.msra.mxu0 %v2894_v37  ;;  %2901 = vmatpush3.bf16.msra.mxu1 %v2900_v38  ;;  %v2546_v37 = vld [vmem:[%s3588_s7 + $0x2] ss:$0 sm:$0xff] }
  0x2c   : > { %2902 = vmatprep.subr.bf16.mxu0 %v3068_v3  ;;  %2908 = vmatprep.subr.bf16.mxu1 %v3068_v3 }
  0x2e   : > { %2727 = vmatmul.mubr.msk.f32.vlgmr.msra.gmra.mrb[4].mxu0 %vm510_vm1, %v464_v43  ;;  %2738 = vmatmul.mubr.msk.f32.vlgmr.msra.gmra.mrb[4].mxu1 %vm510_vm1, %v464_v43 }
  0x2f   : > { %2904 = vmatpush3.bf16.msra.mxu0 %v2903_v44  ;;  %2910 = vmatpush3.bf16.msra.mxu1 %v2909_v45 }
  0x30   : > { %2905 = vmatprep.subr.bf16.mxu0 %v3068_v3  ;;  %2911 = vmatprep.subr.bf16.mxu1 %v3068_v3 }
  0x31   : > { %2748 = vmatprep.mubr.msk.f32.mxu0 %vm3069_vm0, %v3070_v11  ;;  %2759 = vmatprep.mubr.msk.f32.mxu1 %vm3069_vm0, %v3070_v11 }
  0x32   : > { %v2981_v2 = vpop.eup %2980 }
  0x33   : > { %2907 = vmatpush3.bf16.msra.mxu0 %v2906_v50  ;;  %2913 = vmatpush3.bf16.msra.mxu1 %v2912_v51 }
  0x34   : > { %2914 = vmatprep.subr.bf16.mxu0 %v3068_v3  ;;  %2920 = vmatprep.subr.bf16.mxu1 %v3068_v3 }
  0x36   : > { %2749 = vmatmul.mubr.msk.f32.vlgmr.msra.gmra.mrb[6].mxu0 %vm510_vm1, %v464_v43  ;;  %2760 = vmatmul.mubr.msk.f32.vlgmr.msra.gmra.mrb[6].mxu1 %vm510_vm1, %v464_v43 }
  0x37   : > { %2916 = vmatpush3.bf16.msra.mxu0 %v2915_v56  ;;  %2922 = vmatpush3.bf16.msra.mxu1 %v2921_v57 }
  0x38   : > { %2917 = vmatprep.subr.bf16.mxu0 %v3068_v3  ;;  %2923 = vmatprep.subr.bf16.mxu1 %v3068_v3 }
  0x39   : > { %2770 = vmatprep.mubr.msk.f32.mxu0 %vm3069_vm0, %v3070_v11  ;;  %2781 = vmatprep.mubr.msk.f32.mxu1 %vm3069_vm0, %v3070_v11 }
  0x3b   : > { %2919 = vmatpush3.bf16.msra.mxu0 %v2918_v61  ;;  %2925 = vmatpush3.bf16.msra.mxu1 %v2924_v63  ;;  %v1762_v61 = vmax.f32 %v1758_v59, 1e-06  ;;  %v1760_v63 = vld [vmem:[%s462_s20 + $0x18] sm:$0xff]  ;;  %s443_s20 = sand.u32 1, %s3058_s22  }
  0x3c   : > { %2926 = vmatprep.subr.bf16.mxu0 %v3068_v3  ;;  %2932 = vmatprep.subr.bf16.mxu1 %v3068_v3  ;;  %v1764_v1 = vmax.f32 %v1760_v63, 1e-06  ;;  %s2538_s26 = sshll.u32 %s443_s20, 3  ;;  %s2426_s30 = scalar_lea.sflag [#allocation3], %s443_s20 }
  0x3d   : > { %2982 = vlog2.f32 %v1762_v61  ;;  %v2563_v61 = vld [vmem:[%s3590_s9 + $0x3] ss:$0 sm:$0xff]  ;;  %s445_s17 = scalar_lea.vmem [#allocation2], %s2538_s26  ;;  %s3010_s26 = scalar_lea.vmem %s3009_s19, 256 }
  0x3e   : > { %2771 = vmatmul.mubr.msk.f32.vlgmr.msra.gmra.mrb[8].mxu0 %vm510_vm1, %v465_v4  ;;  %2782 = vmatmul.mubr.msk.f32.vlgmr.msra.gmra.mrb[8].mxu1 %vm510_vm1, %v465_v4  ;;  %2984 = vlog2.f32 %v1763_v0  ;;  %s2439_s1 = sshll.u32 %s445_s17, 4  ;;  %s3540_s1 = int_to_ptr.vmem [resolvable:$true] %s2439_s1 }
  0x3f   : > { %2928 = vmatpush3.bf16.msra.mxu0 %v2927_v5  ;;  %2934 = vmatpush3.bf16.msra.mxu1 %v2933_v7  ;;  %2986 = vlog2.f32 %v1764_v1  ;;  %v1766_v5 = vmul.f32 0.6931472, %v2981_v2  ;;  %s3004_s23 = scalar_lea.vmem %s3540_s1, 128  ;;  %p3011_p0 = scmp.lt.s32.totalorder %s3540_s1, %s3009_s19 }
  0x40   : > { %2929 = vmatprep.subr.bf16.mxu0 %v3068_v3  ;;  %2935 = vmatprep.subr.bf16.mxu1 %v3068_v3  ;;  %p3005_p11 = scmp.ne.s32.totalorder %s3540_s1, %s3004_s23  ;;  %p3012_p1 = scmp.lt.s32.totalorder %s3010_s26, %s3004_s23 }
  0x41   : > { %2792 = vmatprep.mubr.msk.f32.mxu0 %vm3069_vm0, %v3070_v11  ;;  %2803 = vmatprep.mubr.msk.f32.mxu1 %vm3069_vm0, %v3070_v11 }
  0x42   : > { %p3006_p12 = pnand %p3005_p11, %p3175_p5  ;;  %p3013_p2 = por %p3012_p1, %p3011_p0 }
  0x43   : > { %2931 = vmatpush3.bf16.msra.mxu0 %v2930_v12  ;;  %2937 = vmatpush3.bf16.msra.mxu1 %v2936_v14 }
  0x44   : > { %2806 = vmatprep.subr.mxu0 %v3070_v11  ;;  %2811 = vmatprep.subr.mxu1 %v3070_v11  ;;  %p3007_p13 = pneg %p3006_p12 }
  0x46   : > { %2793 = vmatmul.mubr.msk.f32.vlgmr.msra.gmra.mrb[10].mxu0 %vm510_vm1, %v465_v4  ;;  %2804 = vmatmul.mubr.msk.f32.vlgmr.msra.gmra.mrb[10].mxu1 %vm510_vm1, %v465_v4  ;;  %p3014_p3 = pnand %p3013_p2, %p3007_p13 }
  0x47   : > { %2808 = vmatprep.mubr.msk.f32.mxu0 %vm3069_vm0, %v3070_v11  ;;  %2813 = vmatprep.mubr.msk.f32.mxu1 %vm3069_vm0, %v3070_v11  ;;  %v2983_v4 = vpop.eup %2982 }
  0x48   : > { %v1768_v7 = vmul.f32 0.6931472, %v2983_v4 }
  0xf1   : > { %v580_v3 = vpop.f32.mrb[0].mxu0  ;;  %v650_v16 = vpop.f32.mrb[0].mxu1 }
  0xf2   : > { %v2684_v15 = vpop.f32.mrb[1].mxu0  ;;  %v2695_v17 = vpop.f32.mrb[1].mxu1  ;;  %v581_v32 = vadd.f32 %v2544_v25, %v580_v3  ;;  %v651_v33 = vadd.f32 %v2545_v29, %v650_v16 }
  0xf3   : > { %v2985_v3 = vpop.eup %2984 }
  0xf4   : > { %v2987_v16 = vpop.eup %2986 }
  0xf9   : > { %v720_v18 = vpop.f32.mrb[2].mxu0  ;;  %v790_v20 = vpop.f32.mrb[2].mxu1 }
  0xfa   : > { %v2706_v19 = vpop.f32.mrb[3].mxu0  ;;  %v2717_v21 = vpop.f32.mrb[3].mxu1  ;;  %v721_v44 = vadd.f32 %v2546_v37, %v720_v18  ;;  %v791_v45 = vadd.f32 %v2547_v41, %v790_v20  ;;  %v1770_v18 = vmul.f32 0.6931472, %v2985_v3  ;;  %v1772_v20 = vmul.f32 0.6931472, %v2987_v16 }
 0x101   : > { %v907_v24 = vpop.f32.mrb[4].mxu0  ;;  %v977_v27 = vpop.f32.mrb[4].mxu1 }
 0x102   : > { %v908_v26 = vadd.f32 %v2552_v22, %v907_v24  ;;  %v2728_v28 = vpop.f32.mrb[5].mxu0  ;;  %v978_v30 = vadd.f32 %v2553_v23, %v977_v27  ;;  %v2739_v31 = vpop.f32.mrb[5].mxu1 }
 0x104   : > { %2807 = vmatpush3.xpose.msk.msra.mxu0 %vm1448_vm2, %v908_v26  ;;  %2812 = vmatpush3.xpose.msk.msra.mxu1 %vm1448_vm2, %v978_v30 }
 0x105   : > { %2816 = vmatprep.subr.mxu0 %v3070_v11  ;;  %2821 = vmatprep.subr.mxu1 %v3070_v11 }
 0x107   : > { %2809 = vmatmul.mubr.msk.f32.vlgmr.msra.gmra.mrb[12].mxu0 %vm1448_vm2, %v581_v32  ;;  %2814 = vmatmul.mubr.msk.f32.vlgmr.msra.gmra.mrb[12].mxu1 %vm1448_vm2, %v651_v33 }
 0x108   : > { %2818 = vmatprep.mubr.msk.f32.mxu0 %vm3069_vm0, %v3070_v11  ;;  %2823 = vmatprep.mubr.msk.f32.mxu1 %vm3069_vm0, %v3070_v11 }
 0x109   : > { %v1047_v36 = vpop.f32.mrb[6].mxu0  ;;  %v1117_v39 = vpop.f32.mrb[6].mxu1 }
 0x10a   : > { %v1048_v38 = vadd.f32 %v2554_v34, %v1047_v36  ;;  %v2750_v40 = vpop.f32.mrb[7].mxu0  ;;  %v1118_v42 = vadd.f32 %v2555_v35, %v1117_v39  ;;  %v2761_v43 = vpop.f32.mrb[7].mxu1 }
 0x10c   : > { %2817 = vmatpush3.xpose.msk.msra.mxu0 %vm1448_vm2, %v1048_v38  ;;  %2822 = vmatpush3.xpose.msk.msra.mxu1 %vm1448_vm2, %v1118_v42 }
 0x10d   : > { %2826 = vmatprep.subr.mxu0 %v3070_v11  ;;  %2831 = vmatprep.subr.mxu1 %v3070_v11 }
 0x10f   : > { %2819 = vmatmul.mubr.msk.f32.vlgmr.msra.gmra.mrb[14].mxu0 %vm1448_vm2, %v721_v44  ;;  %2824 = vmatmul.mubr.msk.f32.vlgmr.msra.gmra.mrb[14].mxu1 %vm1448_vm2, %v791_v45 }
 0x110   : > { %2828 = vmatprep.mubr.msk.f32.mxu0 %vm3069_vm0, %v3070_v11  ;;  %2833 = vmatprep.mubr.msk.f32.mxu1 %vm3069_vm0, %v3070_v11 }
 0x111   : > { %v1234_v48 = vpop.f32.mrb[8].mxu0  ;;  %v1304_v51 = vpop.f32.mrb[8].mxu1 }
 0x112   : > { %v1235_v49 = vadd.f32 %v2560_v46, %v1234_v48  ;;  %v2772_v50 = vpop.f32.mrb[9].mxu0  ;;  %v1305_v52 = vadd.f32 %v2561_v47, %v1304_v51  ;;  %v2783_v53 = vpop.f32.mrb[9].mxu1 }
 0x114   : > { %2827 = vmatpush3.msra.mxu0 %v1235_v49  ;;  %2832 = vmatpush3.msra.mxu1 %v1305_v52 }
 0x115   : > { %2836 = vmatprep.subr.mxu0 %v3070_v11  ;;  %2841 = vmatprep.subr.mxu1 %v3070_v11 }
 0x119   : > { %v3466_v54 = vpop.f32.mrb[10].mxu0  ;;  %v3468_v55 = vpop.f32.mrb[10].mxu1 }
 0x11a   : > { %v2794_v56 = vpop.f32.mrb[11].mxu0  ;;  %v2805_v57 = vpop.f32.mrb[11].mxu1  ;;  %v1445_v0 = vadd.f32 %v2563_v61, %v3468_v55  ;;  %v2113_v55 = vld [vmem:[%s3591_s10] sm:$0xff] }
 0x11b   : > { %v2562_v56 = vld [vmem:[%s3590_s9 + $0x2] ss:$0 sm:$0xff] }
 0x11c   : > { %v1375_v60 = vadd.f32 %v2562_v56, %v3466_v54 }
 0x1da   : > { %v1521_v6 = vpop.f32.mrb[12].mxu0  ;;  %v1597_v9 = vpop.f32.mrb[12].mxu1 }
 0x1db   : > { %v1753_v8 = vmul.f32 0.35355338, %v1521_v6  ;;  %v2810_v10 = vpop.f32.mrb[13].mxu0  ;;  %v1754_v12 = vmul.f32 0.35355338, %v1597_v9  ;;  %v2815_v13 = vpop.f32.mrb[13].mxu1 }
 0x1dc   : > { %v2115_v6 = vld [vmem:[%s3591_s10 + $0x10] sm:$0xff]  ;;  %v2116_v9 = vld [vmem:[%s3591_s10 + $0x18] sm:$0xff] }
 0x1dd   : > { %v1773_v14 = vadd.f32 %v1766_v5, %v1753_v8  ;;  %v1774_v15 = vadd.f32 %v1768_v7, %v1754_v12  ;;  %v2114_v5 = vld [vmem:[%s3591_s10 + $0x8] sm:$0xff] }
 0x1df   : > { %v1777_v17 = vsel %vm1448_vm2, %v1773_v14, -inf  ;;  %v1780_v24 = vsel %vm1448_vm2, %v1774_v15, -inf }
 0x1e0   : > { %1778 = vmax.xlane.f32.xlu0 %v1777_v17 }
 0x1e2   : > { %v1673_v19 = vpop.f32.mrb[14].mxu0  ;;  %v1749_v22 = vpop.f32.mrb[14].mxu1 }
 0x1e3   : > { %v1755_v21 = vmul.f32 0.35355338, %v1673_v19  ;;  %v2820_v23 = vpop.f32.mrb[15].mxu0  ;;  %v1756_v25 = vmul.f32 0.35355338, %v1749_v22  ;;  %v2825_v26 = vpop.f32.mrb[15].mxu1 }
 0x1e4   : > { %1781 = vmax.xlane.f32.xlu0 %v1780_v24 }
 0x1e5   : > { %v1775_v27 = vadd.f32 %v1770_v18, %v1755_v21  ;;  %v1776_v28 = vadd.f32 %v1772_v20, %v1756_v25 }
 0x1e7   : > { %v1783_v29 = vsel %vm1448_vm2, %v1775_v27, -inf  ;;  %v1786_v30 = vsel %vm1448_vm2, %v1776_v28, -inf }
 0x1e8   : > { %1784 = vmax.xlane.f32.xlu1 %v1783_v29 }
 0x1ec   : > { %1787 = vmax.xlane.f32.xlu1 %v1786_v30 }
 0x26d   : > { %v1779_v31 = vpop.xlane.xlu0 %1778 }
 0x26e   : > { %v1789_v32 = vsub.f32 %v1773_v14, %v1779_v31 }
 0x270   : > { %v1793_v33 = vmul.f32 1.442695, %v1789_v32 }
 0x271   : > { %v1782_v34 = vpop.xlane.xlu0 %1781 }
 0x272   : > { %2988 = vpow2.f32 %v1793_v33  ;;  %v1790_v35 = vsub.f32 %v1774_v15, %v1782_v34 }
 0x274   : > { %v1795_v36 = vmul.f32 1.442695, %v1790_v35 }
 0x275   : > { %v1785_v37 = vpop.xlane.xlu1 %1784 }
 0x276   : > { %2990 = vpow2.f32 %v1795_v36  ;;  %v1791_v38 = vsub.f32 %v1775_v27, %v1785_v37 }
 0x278   : > { %v1797_v39 = vmul.f32 1.442695, %v1791_v38 }
 0x279   : > { %v1788_v40 = vpop.xlane.xlu1 %1787 }
 0x27a   : > { %2992 = vpow2.f32 %v1797_v39  ;;  %v1792_v41 = vsub.f32 %v1776_v28, %v1788_v40  ;;  %v2584_v28 = vld [vmem:[%s3592_s11] ss:$0 sm:$0xff] }
 0x27c   : > { %v2989_v42 = vpop.eup %2988  ;;  %v1799_v43 = vmul.f32 1.442695, %v1792_v41 }
 0x27d   : > { %v1801_v44 = vsel %vm1448_vm2, %v2989_v42, 0.0 }
 0x27e   : > { %2994 = vpow2.f32 %v1799_v43  ;;  %1802 = vadd.xlane.f32.xlu0 %v1801_v44 }
 0x280   : > { %v2991_v45 = vpop.eup %2990 }
 0x281   : > { %v1804_v46 = vsel %vm1448_vm2, %v2991_v45, 0.0 }
 0x282   : > { %1805 = vadd.xlane.f32.xlu1 %v1804_v46 }
 0x284   : > { %v2993_v47 = vpop.eup %2992 }
 0x285   : > { %v1807_v48 = vsel %vm1448_vm2, %v2993_v47, 0.0 }
 0x286   : > { %1808 = vadd.xlane.f32.xlu0 %v1807_v48 }
 0x288   : > { %v2995_v49 = vpop.eup %2994 }
 0x289   : > { %v1810_v50 = vsel %vm1448_vm2, %v2995_v49, 0.0 }
 0x28a   : > { %1811 = vadd.xlane.f32.xlu1 %v1810_v50 }
 0x30b   : > { %v1803_v51 = vpop.xlane.xlu0 %1802 }
 0x30c   : > { %2996 = vrcp.f32 %v1803_v51 }
 0x30f   : > { %v1806_v52 = vpop.xlane.xlu1 %1805 }
 0x310   : > { %2998 = vrcp.f32 %v1806_v52 }
 0x313   : > { %v1809_v53 = vpop.xlane.xlu0 %1808 }
 0x314   : > { %3000 = vrcp.f32 %v1809_v53 }
 0x316   : > { %v2997_v57 = vpop.eup %2996 }
 0x317   : > { %v1814_v58 = vmul.f32 %v2997_v57, %v2989_v42  ;;  %v1812_v59 = vpop.xlane.xlu1 %1811 }
 0x318   : > { %3002 = vrcp.f32 %v1812_v59 }
 0x319   : > { %2829 = vmatmul.mubr.msk.f32.vlgmr.msra.gmra.mrb[16].mxu0 %vm1448_vm2, %v1814_v58 }
 0x31a   : > { %v2999_v62 = vpop.eup %2998  ;;  %2837 = vmatpush3.msra.mxu0 %v1375_v60  ;;  %2838 = vmatprep.mubr.msk.f32.mxu0 %vm3069_vm0, %v3070_v11 }
 0x31b   : > { %v1816_v63 = vmul.f32 %v2999_v62, %v2991_v45  ;;  %2846 = vmatprep.subr.mxu0 %v3070_v11 }
 0x31d   : > { %2834 = vmatmul.mubr.msk.f32.vlgmr.msra.gmra.mrb[16].mxu1 %vm1448_vm2, %v1816_v63 }
 0x31e   : > { %v3001_v54 = vpop.eup %3000  ;;  %2842 = vmatpush3.msra.mxu1 %v1445_v0  ;;  %2843 = vmatprep.mubr.msk.f32.mxu1 %vm3069_vm0, %v3070_v11 }
 0x31f   : > { %v1818_v1 = vmul.f32 %v3001_v54, %v2993_v47  ;;  %2851 = vmatprep.subr.mxu1 %v3070_v11 }
 0x321   : > { %2839 = vmatmul.mubr.msk.f32.vlgmr.msra.gmra.mrb[18].mxu0 %vm1448_vm2, %v1818_v1 }
 0x322   : > { %v3003_v2 = vpop.eup %3002  ;;  %2848 = vmatprep.mubr.msk.f32.mxu0 %vm3069_vm0, %v3070_v11  ;;  %2847 = vmatpush3.msra.mxu0 %v2113_v55 }
 0x323   : > { %v1820_v4 = vmul.f32 %v3003_v2, %v2995_v49  ;;  %2856 = vmatprep.subr.mxu0 %v3070_v11 }
 0x325   : > { %2844 = vmatmul.mubr.msk.f32.vlgmr.msra.gmra.mrb[18].mxu1 %vm1448_vm2, %v1820_v4 }
 0x326   : > { %2853 = vmatprep.mubr.msk.f32.mxu1 %vm3069_vm0, %v3070_v11  ;;  %2852 = vmatpush3.msra.mxu1 %v2114_v5 }
 0x327   : > { %2861 = vmatprep.subr.mxu1 %v3070_v11 }
 0x3ec   : > { %v1890_v7 = vpop.f32.mrb[16].mxu0 }
 0x3ed   : > { %v2830_v8 = vpop.f32.mrb[17].mxu0  ;;  %2849 = vmatmul.mubr.msk.f32.vlgmr.msra.gmra.mrb[20].mxu0 %vm1448_vm2, %v1890_v7 }
 0x3ee   : > { %2857 = vmatpush3.msra.mxu0 %v2115_v6  ;;  %2858 = vmatprep.mubr.msk.f32.mxu0 %vm3069_vm0, %v3070_v11 }
 0x3f0   : > { %v1963_v10 = vpop.f32.mrb[16].mxu1 }
 0x3f1   : > { %v2835_v12 = vpop.f32.mrb[17].mxu1  ;;  %2854 = vmatmul.mubr.msk.f32.vlgmr.msra.gmra.mrb[20].mxu1 %vm1448_vm2, %v1963_v10 }
 0x3f2   : > { %2862 = vmatpush3.msra.mxu1 %v2116_v9  ;;  %2863 = vmatprep.mubr.msk.f32.mxu1 %vm3069_vm0, %v3070_v11 }
 0x3f4   : > { %v2036_v13 = vpop.f32.mrb[18].mxu0 }
 0x3f5   : > { %v2840_v14 = vpop.f32.mrb[19].mxu0  ;;  %2859 = vmatmul.mubr.msk.f32.vlgmr.msra.gmra.mrb[22].mxu0 %vm1448_vm2, %v2036_v13 }
 0x3f8   : > { %v2109_v3 = vpop.f32.mrb[18].mxu1 }
 0x3f9   : > { %v2845_v15 = vpop.f32.mrb[19].mxu1  ;;  %2864 = vmatmul.mubr.msk.f32.vlgmr.msra.gmra.mrb[22].mxu1 %vm1448_vm2, %v2109_v3 }
 0x4c0   : > { %v2186_v16 = vpop.f32.mrb[20].mxu0 }
 0x4c1   : > { %v2850_v17 = vpop.f32.mrb[21].mxu0  ;;  %v2409_v19 = vsel %vm510_vm1, %v2186_v16, 0.0 }
 0x4c4   : > { %v2259_v18 = vpop.f32.mrb[20].mxu1 }
 0x4c5   : > { %v2410_v20 = vsel %vm510_vm1, %v2259_v18, 0.0  ;;  %v2855_v21 = vpop.f32.mrb[21].mxu1 }
 0x4c6   : > { %v2411_v22 = vadd.f32 %v2410_v20, %v2409_v19 }
 0x4c8   : > { %v2332_v11 = vpop.f32.mrb[22].mxu0 }
 0x4c9   : > { %v2412_v23 = vsel %vm510_vm1, %v2332_v11, 0.0  ;;  %v2860_v24 = vpop.f32.mrb[23].mxu0 }
 0x4ca   : > { %v2413_v25 = vadd.f32 %v2412_v23, %v2411_v22 }
 0x4cc   : > { %v2405_v26 = vpop.f32.mrb[22].mxu1 }
 0x4cd   : > { %v2414_v27 = vsel %vm510_vm1, %v2405_v26, 0.0  ;;  %v2865_v29 = vpop.f32.mrb[23].mxu1 }
 0x4ce   : > { %v2415_v30 = vadd.f32 %v2414_v27, %v2413_v25 }
 0x4d0   : > { %v2423_v31 = vadd.f32 %v2584_v28, %v2415_v30 }
 0x4d2   : > { %2424 = vst.msk [vmem:[%s445_s17] sm:$0xff] %vm510_vm1, %v2423_v31 }
 0x4d3   : > { %3017 = shalt.err (!%p3014_p3)
}
 0x4d4   : > { %s3018_s20 = scalar_lea.hbm %s3538_s18, 128  ;;  %s3022_s15 = scalar_lea.hbm %s3593_s12, 256 }
 0x4d5   : > { %p3019_p4 = scmp.ne.s32.totalorder %s3538_s18, %s3018_s20  ;;  %p3023_p9 = scmp.lt.u32.totalorder %s3538_s18, %s3593_s12 }
 0x4d6   : > { %p3024_p10 = scmp.lt.u32.totalorder %s3022_s15, %s3018_s20  ;;  %p3026_p12 = scmp.lt.u32.totalorder %s3018_s20, %s3538_s18 }
 0x4d7   : > { %p3020_p7 = pnand %p3019_p4, %p3175_p5 }
 0x4d8   : > { %p3025_p11 = por %p3024_p10, %p3023_p9 }
 0x4d9   : > { %p3021_p8 = pneg %p3020_p7 }
 0x4da   : > { %p3027_p13 = por %p3026_p12, %p3025_p11 }
 0x4dc   : > { %p3028_p0 = pnand %p3027_p13, %p3021_p8 }
 0x4de   : > { %3031 = shalt.err (!%p3028_p0)
}
 0x4df   : > { %2938 = dma.vmem_to_hbm [thread:$0]  (%p3175_p5), %s3540_s1, 128, %s3538_s18, %s2426_s30  }
 0x4e0 PF: > { %p2944_p1 = scmp.ge.s32.totalorder %s3066_s24, 2  ;;  %s2451_s0 = sand.u32 1, %s3054_s21  }
 0x4e1   : > { %s2452_s23 = scalar_lea.sflag [#allocation3], %s2451_s0 }
 0x4e2   : > { %p2941_p2 = pnand %p2944_p1, %p3179_p6 }
 0x4e4   : > { %3049 = dma.done.wait (!%p2941_p2), %s2452_s23, 128  }
 0x4e5   : > { %3051 = vsyncadd (!%p2941_p2), %s2452_s23, 4294967168  ;;  %s3603_s25 = sld [smem:[#allocation5_spill]]  ;;  %s3604_s23 = sld [smem:[#allocation6_spill]] }
 0x4e6   : > { %p22_p3 = scmp.ge.s32.totalorder %s3162_s27, 4   ;;  %s3605_s21 = smov %s3058_s22 }
 0x4e7   : > { %s3607_s24 = smov %s3162_s27 }
 0x4e8   :  { %24 = sbr.rel (!%p22_p3) target bundleno = 6 (0x6), region = 112 }
 0x4eb   : > { %s3606_s22 = smov %s3603_s25 }
 0x4ef   :  { %2457 = vsyncpa [#allocation3], 1 }
 0x4f0   :  { %2459 = vsyncpa [#allocation3 + $0x1], 1 }

</bundles_post_ra>
